<compile_context>
chip_gen: v6e
topology: v6e:2x2x1
jax: 0.10.0
libtpu: 0.0.40
codegen_flags: <defaults>
</compile_context>

<pallas_src>
import jax
import jax.numpy as jnp
from jax.experimental import pallas as pl
from jax.experimental.pallas import tpu as pltpu

BN_EPS = 1e-5


def _se_kernel(x_ref, w1_ref, b1_ref, w2_ref, o_ref):
    # x_ref / o_ref: (NB, C, HW) in the input dtype.

    # Global average pool: sum over the lane axis, accumulated in f32.
    # The 1/(H*W) scale is folded into w1 together with eval-mode BatchNorm.
    pooled = jnp.sum(x_ref[...], axis=-1, dtype=jnp.float32)        # (NB, C)

    # 1x1 conv C->E with folded BN affine, then ReLU.
    z = jnp.dot(pooled, w1_ref[...],
                preferred_element_type=jnp.float32)                 # (NB, E)
    z = jnp.maximum(z + b1_ref[...], 0.0)

    # 1x1 conv E->C, then Hardsigmoid: clip(x/6 + 0.5, 0, 1).
    s = jnp.dot(z, w2_ref[...],
                preferred_element_type=jnp.float32)                 # (NB, C)
    s = jnp.clip(s * (1.0 / 6.0) + 0.5, 0.0, 1.0)

    # Per-channel rescale.  Re-index x_ref (second use) so no block-sized
    # value is live across the matmuls; multiply + store stay in the input
    # dtype (packed bf16 stores on v5e).
    scale = s[:, :, None].astype(o_ref.dtype)
    o_ref[...] = (x_ref[...] * scale).astype(o_ref.dtype)


def _vmem_config():
    """Generation-aware (block_budget_bytes, vmem_limit_bytes, num_cores)."""
    cap = 128 * 1024 * 1024
    try:
        cap = int(getattr(pltpu.get_tpu_info(), "vmem_capacity_bytes", cap))
    except Exception:
        pass
    if cap <= 64 * 1024 * 1024:
        # v7x: 64 MiB per TensorCore, 2 TCs/chip -> smaller blocks, raise limit.
        return 20 * 1024 * 1024, 48 * 1024 * 1024, 2
    # v5e / v6e: 128 MiB VMEM, 1 TC/chip -> big blocks amortize per-step cost.
    return 64 * 1024 * 1024, 96 * 1024 * 1024, 1


def _pick_batch_tile(n, per_sample_bytes, block_budget, num_cores):
    """Largest NB whose double-buffered in+out blocks fit the budget.  NB
    need not divide n (cdiv grid).  Shrink only to keep >= 2 grid steps per
    TensorCore, and only while each block stays >= ~1 MiB."""
    nb = max(1, min(n, block_budget // (4 * max(per_sample_bytes, 1))))
    min_steps = 2 * num_cores
    nb_for_steps = max(1, pl.cdiv(n, min_steps))
    if nb_for_steps * per_sample_bytes >= (1 << 20):
        nb = min(nb, nb_for_steps)
    return max(1, nb)


def se_module(x, w1, w2, gamma, beta, running_mean, running_var, *,
              batch_tile=None):
    """x: (N, C, H, W).  w1: (C, E), w2: (E, C) (pre-transposed 1x1 weights).

    Returns x * hardsigmoid(conv2(relu(bn(conv1(avgpool(x)))))), eval-mode BN.
    """
    N, C, H, W = x.shape
    HW = H * W
    E = w1.shape[1]
    assert w1.shape == (C, E) and w2.shape == (E, C)

    # --- Host-side folding of BN + pooling scale (once, outside the kernel) --
    inv_std = jax.lax.rsqrt(running_var.astype(jnp.float32) + BN_EPS)
    bn_scale = gamma.astype(jnp.float32) * inv_std                   # (E,)
    w1_f = (w1.astype(jnp.float32) * bn_scale[None, :]) / float(HW)  # (C, E)
    b1_f = (beta.astype(jnp.float32)
            - running_mean.astype(jnp.float32) * bn_scale).reshape(1, E)
    w2_f = w2.astype(jnp.float32)

    # --- Free layout change: (N, C, H, W) -> (N, C, HW).  No pad, no copy. ---
    x2 = x.reshape(N, C, HW)

    # --- Batch-tile / grid selection ------------------------------------------
    block_budget, vmem_limit, num_cores = _vmem_config()
    itemsize = x2.dtype.itemsize
    per_sample = C * HW * itemsize
    NB = batch_tile if batch_tile is not None else _pick_batch_tile(
        N, per_sample, block_budget, num_cores)
    # cdiv grid: the partial last block (if any) computes on garbage rows that
    # are never written back (each sample is independent; OOB stores masked).
    grid = (pl.cdiv(N, NB),)

    cost = pl.CostEstimate(
        flops=int(4 * N * C * E + 2 * N * C * HW),
        transcendentals=0,
        bytes_accessed=int(2 * N * C * HW * itemsize
                           + 4 * (w1_f.size + b1_f.size + w2_f.size)),
    )

    full2d = lambda b: (0, 0)
    out2 = pl.pallas_call(
        _se_kernel,
        out_shape=jax.ShapeDtypeStruct((N, C, HW), x.dtype),
        grid_spec=pltpu.PrefetchScalarGridSpec(
            num_scalar_prefetch=0,
            grid=grid,
            in_specs=[
                # Last two block dims equal the full array dims -> exempt from
                # the (8, 128) divisibility rule; HBM traffic is unpadded.
                pl.BlockSpec((NB, C, HW), lambda b: (b, 0, 0)),
                pl.BlockSpec((C, E), full2d),
                pl.BlockSpec((1, E), full2d),
                pl.BlockSpec((E, C), full2d),
            ],
            out_specs=pl.BlockSpec((NB, C, HW), lambda b: (b, 0, 0)),
        ),
        compiler_params=pltpu.CompilerParams(
            dimension_semantics=("parallel",),
            vmem_limit_bytes=vmem_limit,
        ),
        cost_estimate=cost,
    )(x2, w1_f, b1_f, w2_f)

    return out2.reshape(N, C, H, W)


def _reference(x, w1, w2, gamma, beta, rm, rv):
    # Pure-JAX reference of the PyTorch forward pass (eval-mode BN).
    pooled = jnp.mean(x.astype(jnp.float32), axis=(2, 3))            # (N, C)
    z = jnp.dot(pooled, w1, precision=jax.lax.Precision.HIGHEST)     # (N, E)
    z = (z - rm) * gamma / jnp.sqrt(rv + BN_EPS) + beta
    z = jnp.maximum(z, 0.0)
    s = jnp.dot(z, w2, precision=jax.lax.Precision.HIGHEST)          # (N, C)
    s = jnp.clip(s / 6.0 + 0.5, 0.0, 1.0)
    return (x.astype(jnp.float32) * s[:, :, None, None]).astype(x.dtype)


def _run_case(key, N, C, H, W, reduction=4, batch_tile=None):
    E = max(C // reduction, 8)
    k_x, k_w1, k_w2, k_g, k_b, k_rm, k_rv = jax.random.split(key, 7)
    x = jax.random.normal(k_x, (N, C, H, W), dtype=jnp.float32)
    # Conv weights stored pre-transposed for the kernel:
    #   w1 = conv1.weight[:, :, 0, 0].T,  w2 = conv2.weight[:, :, 0, 0].T
    w1 = jax.random.normal(k_w1, (C, E), dtype=jnp.float32) * 0.5
    w2 = jax.random.normal(k_w2, (E, C), dtype=jnp.float32) * 0.5
    gamma = 1.0 + 0.1 * jax.random.normal(k_g, (E,), dtype=jnp.float32)
    beta = 0.1 * jax.random.normal(k_b, (E,), dtype=jnp.float32)
    rm = 0.1 * jax.random.normal(k_rm, (E,), dtype=jnp.float32)
    rv = jnp.abs(1.0 + 0.1 * jax.random.normal(k_rv, (E,), dtype=jnp.float32))

    out = jax.block_until_ready(
        se_module(x, w1, w2, gamma, beta, rm, rv, batch_tile=batch_tile))
    ref = _reference(x, w1, w2, gamma, beta, rm, rv)
    assert out.shape == (N, C, H, W)
    assert jnp.allclose(out, ref, atol=1e-5, rtol=1e-4), \
        f"mismatch vs reference for shape {(N, C, H, W)}"


if __name__ == "__main__":
    key = jax.random.PRNGKey(0)
    k1, k2, k3 = jax.random.split(key, 3)

    # Primary small case: HW = 256 (lane-aligned), auto batch tile.
    _run_case(k1, N=2, C=4, H=16, W=16)

    # Non-128-aligned HW (7*7 = 49): no host pad, unpadded HBM traffic.
    _run_case(k2, N=4, C=16, H=7, W=7)

    # cdiv grid with a partial last block (N=3, NB=2): OOB rows never stored.
    _run_case(k3, N=3, C=8, H=7, W=7, batch_tile=2)

    print("KERNEL_OK")
</pallas_src>

<mosaic_0001>
module attributes {stable_mosaic.version = 11 : i64} {
  func.func @_se_kernel(%arg0: i32, %arg1: memref<2x4x256xf32, #tpu.memory_space<vmem>>, %arg2: memref<4x8xf32, #tpu.memory_space<vmem>>, %arg3: memref<1x8xf32, #tpu.memory_space<vmem>>, %arg4: memref<8x4xf32, #tpu.memory_space<vmem>>, %arg5: memref<2x4x256xf32, #tpu.memory_space<vmem>>) attributes {dimension_semantics = [#tpu.dimension_semantics<parallel>], iteration_bounds = array<i64: 1>, scalar_prefetch = 0 : i64, scratch_operands = 0 : i64, tpu.core_type = #tpu.core_type<tc>, window_params = [{transform_indices = @transform_0, window_bounds = array<i64: 2, 4, 256>}, {pipeline_mode = #tpu.pipeline_mode<synchronous>, transform_indices = @transform_1, window_bounds = array<i64: 4, 8>}, {pipeline_mode = #tpu.pipeline_mode<synchronous>, transform_indices = @transform_2, window_bounds = array<i64: 1, 8>}, {pipeline_mode = #tpu.pipeline_mode<synchronous>, transform_indices = @transform_3, window_bounds = array<i64: 8, 4>}, {transform_indices = @transform_4, window_bounds = array<i64: 2, 4, 256>}]} {
    %c0 = arith.constant 0 : index
    %c0_0 = arith.constant 0 : index
    %c0_1 = arith.constant 0 : index
    %0 = vector.load %arg1[%c0, %c0_0, %c0_1] : memref<2x4x256xf32, #tpu.memory_space<vmem>>, vector<2x4x256xf32>
    %cst = arith.constant dense<0.000000e+00> : vector<2x4xf32>
    %1 = vector.multi_reduction <add>, %0, %cst [2] : vector<2x4x256xf32> to vector<2x4xf32>
    %c0_2 = arith.constant 0 : index
    %c0_3 = arith.constant 0 : index
    %2 = vector.load %arg2[%c0_2, %c0_3] : memref<4x8xf32, #tpu.memory_space<vmem>>, vector<4x8xf32>
    %cst_4 = arith.constant dense<0.000000e+00> : vector<2x8xf32>
    %3 = tpu.matmul %1, %2, %cst_4 {dimension_numbers = #tpu.dot_dimension_numbers<[1], [0], [0], [1], [0, 0, 1, 1], [], []>} : vector<2x4xf32>, vector<4x8xf32>, vector<2x8xf32> -> vector<2x8xf32>
    %c0_5 = arith.constant 0 : index
    %c0_6 = arith.constant 0 : index
    %4 = vector.load %arg3[%c0_5, %c0_6] : memref<1x8xf32, #tpu.memory_space<vmem>>, vector<1x8xf32>
    %5 = vector.broadcast %4 : vector<1x8xf32> to vector<2x8xf32>
    %6 = arith.addf %3, %5 : vector<2x8xf32>
    %cst_7 = arith.constant 0.000000e+00 : f32
    %7 = vector.broadcast %cst_7 : f32 to vector<2x8xf32>
    %8 = arith.maximumf %6, %7 : vector<2x8xf32>
    %c0_8 = arith.constant 0 : index
    %c0_9 = arith.constant 0 : index
    %9 = vector.load %arg4[%c0_8, %c0_9] : memref<8x4xf32, #tpu.memory_space<vmem>>, vector<8x4xf32>
    %cst_10 = arith.constant dense<0.000000e+00> : vector<2x4xf32>
    %10 = tpu.matmul %8, %9, %cst_10 {dimension_numbers = #tpu.dot_dimension_numbers<[1], [0], [0], [1], [0, 0, 1, 1], [], []>} : vector<2x8xf32>, vector<8x4xf32>, vector<2x4xf32> -> vector<2x4xf32>
    %cst_11 = arith.constant 0.166666672 : f32
    %11 = vector.broadcast %cst_11 : f32 to vector<2x4xf32>
    %12 = arith.mulf %10, %11 : vector<2x4xf32>
    %cst_12 = arith.constant 5.000000e-01 : f32
    %13 = vector.broadcast %cst_12 : f32 to vector<2x4xf32>
    %14 = arith.addf %12, %13 : vector<2x4xf32>
    %cst_13 = arith.constant 0.000000e+00 : f32
    %cst_14 = arith.constant 1.000000e+00 : f32
    %15 = vector.broadcast %cst_13 : f32 to vector<2x4xf32>
    %16 = arith.maximumf %15, %14 : vector<2x4xf32>
    %17 = vector.broadcast %cst_14 : f32 to vector<2x4xf32>
    %18 = arith.minimumf %17, %16 : vector<2x4xf32>
    %19 = vector.shape_cast %18 : vector<2x4xf32> to vector<2x4x1xf32>
    %c0_15 = arith.constant 0 : index
    %c0_16 = arith.constant 0 : index
    %c0_17 = arith.constant 0 : index
    %20 = vector.load %arg1[%c0_15, %c0_16, %c0_17] : memref<2x4x256xf32, #tpu.memory_space<vmem>>, vector<2x4x256xf32>
    %21 = vector.broadcast %19 : vector<2x4x1xf32> to vector<2x4x256xf32>
    %22 = arith.mulf %20, %21 : vector<2x4x256xf32>
    %c0_18 = arith.constant 0 : index
    %c0_19 = arith.constant 0 : index
    %c0_20 = arith.constant 0 : index
    %23 = vector.load %arg5[%c0_18, %c0_19, %c0_20] : memref<2x4x256xf32, #tpu.memory_space<vmem>>, vector<2x4x256xf32>
    tpu.vector_store %arg5[%c0_18, %c0_19, %c0_20], %22 {strides = array<i32>} : memref<2x4x256xf32, #tpu.memory_space<vmem>>, vector<2x4x256xf32>,
    return
  }
  func.func @transform_0(%arg0: i32) -> (i32, i32, i32) {
    %c0_i32 = arith.constant 0 : i32
    %c0_i32_0 = arith.constant 0 : i32
    %c0_i32_1 = arith.constant 0 : i32
    return %arg0, %c0_i32, %c0_i32_0 : i32, i32, i32
  }
  func.func @transform_1(%arg0: i32) -> (i32, i32) {
    %c0_i32 = arith.constant 0 : i32
    %c0_i32_0 = arith.constant 0 : i32
    %c0_i32_1 = arith.constant 0 : i32
    return %c0_i32, %c0_i32_0 : i32, i32
  }
  func.func @transform_2(%arg0: i32) -> (i32, i32) {
    %c0_i32 = arith.constant 0 : i32
    %c0_i32_0 = arith.constant 0 : i32
    %c0_i32_1 = arith.constant 0 : i32
    return %c0_i32, %c0_i32_0 : i32, i32
  }
  func.func @transform_3(%arg0: i32) -> (i32, i32) {
    %c0_i32 = arith.constant 0 : i32
    %c0_i32_0 = arith.constant 0 : i32
    %c0_i32_1 = arith.constant 0 : i32
    return %c0_i32, %c0_i32_0 : i32, i32
  }
  func.func @transform_4(%arg0: i32) -> (i32, i32, i32) {
    %c0_i32 = arith.constant 0 : i32
    %c0_i32_0 = arith.constant 0 : i32
    %c0_i32_1 = arith.constant 0 : i32
    return %arg0, %c0_i32, %c0_i32_0 : i32, i32, i32
  }
}

</mosaic_0001>

<bundles_post_ra>
// kernel: tpu_custom_call.1
= control target key start
LH: loop header
LB: loop body
LE: loop exit
PB: predicated region body
PF: predicated region fallthrough
CT: control target
= control target key end

     0   :  { %9 = vsyncpa [#allocation3], 0  ;;  %s417_s0 = inlined_call_operand.hbm [shape: f32[2,4,256], index: 0, kind: input, shape index: {}]   ;;  %s418_s1 = inlined_call_operand.vmem [shape: f32[4,8], index: 1, kind: input, shape index: {}]   ;;  %s419_s2 = inlined_call_operand.vmem [shape: f32[1,8], index: 2, kind: input, shape index: {}]   ;;  %s420_s3 = inlined_call_operand.vmem [shape: f32[8,4], index: 3, kind: input, shape index: {}]   ;;  %s421_s4 = inlined_call_operand.hbm [shape: f32[2,4,256], index: 4, kind: output, shape index: {}]  }
   0x1   :  { %10 = vsyncpa [#allocation4], 0  ;;  %s353_s15 = smov [#allocation2]  }
   0x2   :  { %s16_s16 = sshll.u32 %s353_s15, 4  ;;  %s17_s16 = int_to_ptr.vmem [resolvable:$true] %s16_s16 }
   0x3   :  { %s317_s17 = scalar_lea.vmem %s17_s16, 256  ;;  %p322_p1 = scmp.lt.s32.totalorder %s17_s16, %s17_s16 }
   0x4   :  { %p318_p0 = scmp.ne.s32.totalorder %s17_s16, %s317_s17  ;;  %p323_p2 = scmp.lt.s32.totalorder %s317_s17, %s317_s17 }
   0x6   :  { %p324_p3 = por %p323_p2, %p322_p1 }
   0x8   :  { %p325_p4 = pnand %p324_p3, %p318_p0 }
   0xa   :  { %328 = shalt.err (!%p325_p4)
}
   0xb   :  { %s354_s18 = smov 128   ;;  %s355_s19 = smov 8  }
   0xc   :  { %22 = dma.hbm_to_vmem [thread:$0]  %s417_s0, 256, %s17_s16, [#allocation3], %s354_s18, %s354_s18, %s355_s19  }
   0xd   :  { %349 = dma.done.wait [#allocation3], 256  }
   0xe   :  { %350 = vsyncadd [#allocation3], 4294967040  ;;  %vm40_vm0 = vcmask 1043456   ;;  %v32_v0 = vld [vmem:[#allocation2] sm:$0xff]  ;;  %v391_v1 = vld [vmem:[#allocation2 + $0x8] sm:$0xff]  ;;  %v356_v11 = vmov 0.0   ;;  %v61_v12 = vlaneseq }
   0xf   :  { %v36_v2 = vcombine.high %v32_v0, %v32_v0  ;;  %v41_v3 = vsel %vm40_vm0, %v32_v0, 0.0  ;;  %v37_v4 = vcombine.high %v391_v1, %v391_v1  ;;  %v46_v6 = vsel %vm40_vm0, %v391_v1, 0.0  ;;  %v51_v10 = vld [vmem:[%s418_s1] sm:$0xf]  ;;  %290 = vmatprep.subr.mxu0 %v356_v11  ;;  %295 = vmatprep.subr.mxu1 %v356_v11 }
  0x10   :  { %vm357_vm1 = vmmov 0   ;;  %291 = vmatpush3.msk.msra.mxu0 %vm40_vm0, %v51_v10  ;;  %v62_v13 = vand.u32 127, %v61_v12  ;;  %v64_v14 = vshrl.u32 %v61_v12, 7  ;;  %vm71_vm2 = vcmask 1041409   ;;  %v150_v21 = vld [vmem:[%s420_s3] sm:$0xff] }
  0x11   :  { %v42_v5 = vsel %vm40_vm0, %v36_v2, 0.0  ;;  %v47_v7 = vsel %vm40_vm0, %v37_v4, 0.0  ;;  %292 = vmatprep.mubr.msk.f32.mxu0 %vm357_vm1, %v356_v11  ;;  %297 = vmatprep.mubr.msk.f32.mxu1 %vm357_vm1, %v356_v11  ;;  %vm73_vm3 = vcmask 31744   ;;  %v282_v22 = vld [vmem:[%s419_s2] ss:$0 sm:$0xff]  ;;  %vm151_vm4 = vcmask 64512  }
  0x12   :  { %v43_v8 = vadd.f32 %v42_v5, %v41_v3  ;;  %v48_v9 = vadd.f32 %v47_v7, %v46_v6  ;;  %v65_v16 = vsub.s32 %v62_v13, %v64_v14  ;;  %296 = vmatpush3.msra.mxu1 %v150_v21  ;;  %v231_v32 = vsub.s32 0, %v64_v14  ;;  %s359_s2 = smov [#allocation5]  }
  0x13   :  { %v238_v35 = vsub.s32 1, %v64_v14  ;;  %v358_v37 = vmov 839922192   ;;  %s270_s3 = sshll.u32 %s359_s2, 4  ;;  %s271_s3 = int_to_ptr.vmem [resolvable:$true] %s270_s3 }
  0x14   :  { %44 = vadd.xlane.f32.xlu0 %v43_v8  ;;  %v246_v38 = vunpack.c.l.s4 %v358_v37  ;;  %s329_s26 = scalar_lea.vmem %s271_s3, 256  ;;  %p334_p6 = scmp.lt.s32.totalorder %s271_s3, %s271_s3 }
  0x15   :  { %p330_p5 = scmp.ne.s32.totalorder %s271_s3, %s329_s26  ;;  %p335_p7 = scmp.lt.s32.totalorder %s329_s26, %s329_s26 }
  0x16   :  { %v247_v39 = vunpack.c.0.s8 %v246_v38 }
  0x17   :  { %p336_p8 = por %p335_p7, %p334_p6 }
  0x18   :  { %49 = vadd.xlane.f32.xlu0 %v48_v9  ;;  %v250_v40 = vsub.s32 %v247_v39, %v64_v14 }
  0x19   :  { %p337_p9 = pnand %p336_p8, %p330_p5 }
  0x9d   :  { %v45_v15 = vpop.xlane.xlu0 %44 }
  0x9e   :  { %v66_v18 = vrot.slane %v45_v15, %v65_v16 }
  0xa1   :  { %v50_v17 = vpop.xlane.xlu0 %49 }
  0xa2   :  { %v70_v19 = vrot.slane %v50_v17, %v65_v16 }
  0xa4   :  { %v72_v20 = vsel %vm71_vm2, %v70_v19, %v66_v18 }
  0xa5   :  { %293 = vmatmul.mubr.msk.f32.vlgmr.msra.gmra.mxu0 %vm73_vm3, %v72_v20 }
 0x165   :  { %v145_v23 = vpop.f32.mrf.mxu0 }
 0x166   :  { %v146_v24 = vadd.f32 %v282_v22, %v145_v23 }
 0x167   :  { %v294_v25 = vpop.f32.mrf.mxu0 }
 0x168   :  { %v149_v26 = vmax.f32 %v146_v24, 0.0 }
 0x16a   :  { %298 = vmatmul.mubr.msk.f32.vlgmr.msra.gmra.mxu1 %vm151_vm4, %v149_v26 }
 0x22a   :  { %v221_v27 = vpop.f32.mrf.mxu1 }
 0x22b   :  { %v225_v28 = vmul.f32 0.16666667, %v221_v27 }
 0x22c   :  { %v299_v29 = vpop.f32.mrf.mxu1 }
 0x22d   :  { %v226_v30 = vadd.f32 0.5, %v225_v28 }
 0x22f   :  { %v227_v31 = vmax.f32 %v226_v30, 0.0 }
 0x231   :  { %v228_v33 = vmin.f32 %v227_v31, 1.0 }
 0x233   :  { %v232_v34 = vrot.slane %v228_v33, %v231_v32  ;;  %v239_v36 = vrot.slane %v228_v33, %v238_v35 }
 0x235   :  { %234 = vbcast.lane.b32.xlu1 %v232_v34, 256 }
 0x239   :  { %241 = vbcast.lane.b32.xlu1 %v239_v36, 256 }
 0x2a7   :  { %v235_v41 = vpop.permute.xlu1 %234 }
 0x2a8   :  { %v251_v42 = vrot.slane %v235_v41, %v250_v40 }
 0x2aa   :  { %v261_v43 = vmul.f32 %v251_v42, %v32_v0 }
 0x2ab   :  { %v242_v44 = vpop.permute.xlu1 %241 }
 0x2ac   :  { %263 = vst [vmem:[#allocation5] sm:$0xff] %v261_v43  ;;  %v258_v45 = vrot.slane %v242_v44, %v250_v40 }
 0x2ae   :  { %v262_v46 = vmul.f32 %v258_v45, %v391_v1 }
 0x2b0   :  { %264 = vst [vmem:[#allocation5 + $0x8] sm:$0xff] %v262_v46 }
 0x2b1   :  { %340 = shalt.err (!%p337_p9)
}
 0x2b2   :  { %276 = dma.vmem_to_hbm [thread:$0]  %s271_s3, 256, %s421_s4, [#allocation4], %s354_s18, %s354_s18, %s355_s19  }
 0x2b3   :  { %351 = dma.done.wait [#allocation4], 256  }
 0x2b4   :  { %352 = vsyncadd [#allocation4], 4294967040 }
 0x2b5   :  { %280 = vsyncpa [#allocation3], 1 }
 0x2b6   :  { %281 = vsyncpa [#allocation4], 1 }

</bundles_post_ra>
